<compile_context>
chip_gen: v7x
topology: tpu7x:2x2x1
jax: 0.10.0
libtpu: 0.0.40
codegen_flags: <defaults>
</compile_context>

<pallas_src>
from functools import partial

import jax
import jax.numpy as jnp
from jax.experimental import pallas as pl
from jax.experimental.pallas import tpu as pltpu


def _compl_mul_kernel(x_ref, w_ref, o_ref):
    """Per-mode complex channel mix on full (8, 128) tiles.

    x_ref: (2, Cin, R, Mp) f32 -- axis0: real/imag; R = B*Cout rows, x already
           replicated across Cout (row r corresponds to batch r // Cout).
    w_ref: (2, Cin, R, Mp) f32 -- weights pre-tiled across batch
           (row r corresponds to out-channel r % Cout).
    o_ref: (2, R, Mp)      f32 -- o[:, r, m] = sum_i x[:, i, r, m] * w[:, i, r, m]
           as a complex product accumulated over Cin.
    """
    cin = x_ref.shape[1]

    # Peeled i = 0: accumulators initialized directly from the first product.
    a = x_ref[0, 0]          # (R, Mp) -- one full f32 vreg when R=8, Mp=128
    b = x_ref[1, 0]
    c = w_ref[0, 0]
    d = w_ref[1, 0]
    acc_r = a * c - b * d
    acc_i = a * d + b * c

    # Remaining Cin: plain 4-mul/4-add complex product (Cin is small -> unrolled
    # at trace time; live data stays at one vreg per accumulator).
    for i in range(1, cin):
        a = x_ref[0, i]
        b = x_ref[1, i]
        c = w_ref[0, i]
        d = w_ref[1, i]
        acc_r = acc_r + a * c
        acc_r = acc_r - b * d
        acc_i = acc_i + a * d
        acc_i = acc_i + b * c

    # (R, Mp) is a multiple of (8, 128): unmasked full-vreg stores.
    o_ref[0] = acc_r
    o_ref[1] = acc_i


def _lane_pad(m):
    return max(128, ((m + 127) // 128) * 128)


def pack_spectral_weights(weights1, weights2, batch):
    """Hoisted weight packing: call ONCE per (weights, batch), reuse every forward.

    weights*: (Cin, Cout, m1, m2, 2) f32 -> (2, 2, Cin, batch*Cout, Mp) f32
      axis0 = low/high mode block, axis1 = real/imag (torch.view_as_complex order),
      rows pre-tiled across batch so the kernel sees full (8, 128) tiles.
    """
    Cin, Cout, m1, m2, _ = weights1.shape
    M = m1 * m2
    Mp = _lane_pad(M)
    w = jnp.stack([weights1, weights2], axis=0).astype(jnp.float32)  # (2,Cin,Cout,m1,m2,2)
    w = jnp.moveaxis(w, -1, 1).reshape(2, 2, Cin, Cout, M)           # (2,2,Cin,Cout,M)
    w = jnp.tile(w, (1, 1, 1, batch, 1))                             # row r -> o = r % Cout
    buf = jnp.zeros((2, 2, Cin, batch * Cout, Mp), jnp.float32)
    return jax.lax.dynamic_update_slice(buf, w, (0, 0, 0, 0, 0))     # lane pad to Mp


def _pack_x_modes(x_ft, modes1, modes2, cout, Mp):
    """Split real/imag, replicate across Cout, lane-pad: both mode blocks are
    written into a single pre-sized zeros slab (fuses into one XLA computation)."""
    B, Cin, H, _ = x_ft.shape
    M = modes1 * modes2

    def block(z):                                        # z: (B, Cin, m1, m2) complex64
        p = jnp.stack([jnp.real(z), jnp.imag(z)], axis=0)            # (2,B,Cin,m1,m2)
        p = p.reshape(2, B, Cin, M)
        p = jnp.swapaxes(p, 1, 2)                                    # (2,Cin,B,M)
        p = jnp.broadcast_to(p[:, :, :, None, :], (2, Cin, B, cout, M))
        return p.reshape(2, Cin, B * cout, M)                        # row r -> b = r // cout

    buf = jnp.zeros((2, 2, Cin, B * cout, Mp), jnp.float32)
    buf = buf.at[0, :, :, :, :M].set(block(x_ft[:, :, :modes1, :modes2]))
    buf = buf.at[1, :, :, :, :M].set(block(x_ft[:, :, H - modes1:, :modes2]))
    return buf


def compl_mul2d_pallas(x_ft, w_packed, modes1, modes2):
    """einsum('bixy,ioxy->boxy') for both truncated mode blocks in one pallas_call."""
    B, Cin, H, _ = x_ft.shape
    _, _, _, R, Mp = w_packed.shape
    Cout = R // B
    M = modes1 * modes2

    x_packed = _pack_x_modes(x_ft, modes1, modes2, Cout, Mp)         # (2,2,Cin,R,Mp)

    out_packed = pl.pallas_call(
        _compl_mul_kernel,
        grid=(2,),                                                   # low / high block
        in_specs=[
            pl.BlockSpec((None, 2, Cin, R, Mp), lambda blk: (blk, 0, 0, 0, 0)),
            pl.BlockSpec((None, 2, Cin, R, Mp), lambda blk: (blk, 0, 0, 0, 0)),
        ],
        out_specs=pl.BlockSpec((None, 2, R, Mp), lambda blk: (blk, 0, 0, 0)),
        out_shape=jax.ShapeDtypeStruct((2, 2, R, Mp), jnp.float32),
        compiler_params=pltpu.CompilerParams(
            dimension_semantics=("parallel",)),                      # both TCs on v7x
    )(x_packed, w_packed)

    out = out_packed[:, :, :, :M].reshape(2, 2, B, Cout, modes1, modes2)
    out_low = jax.lax.complex(out[0, 0], out[0, 1])
    out_high = jax.lax.complex(out[1, 0], out[1, 1])
    return out_low, out_high


@partial(jax.jit, static_argnames=("dim1", "dim2", "modes1", "modes2"))
def spectral_conv2d_uno_forward(x, w_packed, dim1, dim2, modes1, modes2):
    """Matches SpectralConv2d_Uno.forward; w_packed from pack_spectral_weights()."""
    B = x.shape[0]
    Cout = w_packed.shape[3] // B

    # TODO(synk): rfft2/irfft2 have no Pallas TPU equivalent; they stay in XLA.
    x_ft = jnp.fft.rfft2(x, norm="forward")                # (B, Cin, H, W//2+1) complex64

    out_low, out_high = compl_mul2d_pallas(x_ft, w_packed, modes1, modes2)

    out_ft = jnp.zeros((B, Cout, dim1, dim2 // 2 + 1), dtype=jnp.complex64)
    out_ft = out_ft.at[:, :, :modes1, :modes2].set(out_low)
    out_ft = out_ft.at[:, :, dim1 - modes1:, :modes2].set(out_high)

    return jnp.fft.irfft2(out_ft, s=(dim1, dim2), norm="forward")


def _reference_forward(x, weights1, weights2, dim1, dim2, modes1, modes2):
    """Pure-JAX reference (mirrors the PyTorch module) for validation."""
    B, Cin, H, W = x.shape
    Cout = weights1.shape[1]
    x_ft = jnp.fft.rfft2(x, norm="forward")
    w1c = weights1[..., 0] + 1j * weights1[..., 1]
    w2c = weights2[..., 0] + 1j * weights2[..., 1]
    out_ft = jnp.zeros((B, Cout, dim1, dim2 // 2 + 1), dtype=jnp.complex64)
    out_ft = out_ft.at[:, :, :modes1, :modes2].set(
        jnp.einsum("bixy,ioxy->boxy", x_ft[:, :, :modes1, :modes2], w1c))
    out_ft = out_ft.at[:, :, dim1 - modes1:, :modes2].set(
        jnp.einsum("bixy,ioxy->boxy", x_ft[:, :, H - modes1:, :modes2], w2c))
    return jnp.fft.irfft2(out_ft, s=(dim1, dim2), norm="forward")


if __name__ == "__main__":
    # Module config (small, consistent with the PyTorch __init__ defaults).
    in_codim, out_codim = 4, 4
    dim1, dim2 = 16, 16
    modes1 = dim1 // 2 - 1   # 7
    modes2 = dim2 // 2       # 8
    scale = (1.0 / (2.0 * in_codim)) ** 0.5

    key = jax.random.PRNGKey(0)
    kx, kw1, kw2 = jax.random.split(key, 3)

    x = jax.random.normal(kx, (2, in_codim, 16, 16), dtype=jnp.float32)
    weights1 = scale * jax.random.normal(
        kw1, (in_codim, out_codim, modes1, modes2, 2), dtype=jnp.float32)
    weights2 = scale * jax.random.normal(
        kw2, (in_codim, out_codim, modes1, modes2, 2), dtype=jnp.float32)

    # Weight packing is hoisted out of the per-step forward (done once).
    w_packed = jax.block_until_ready(
        pack_spectral_weights(weights1, weights2, batch=x.shape[0]))

    out = spectral_conv2d_uno_forward(x, w_packed, dim1, dim2, modes1, modes2)
    out = jax.block_until_ready(out)

    ref = jax.block_until_ready(
        _reference_forward(x, weights1, weights2, dim1, dim2, modes1, modes2))

    assert out.shape == (2, out_codim, dim1, dim2), out.shape
    assert out.dtype == jnp.float32
    assert jnp.allclose(out, ref, atol=1e-5, rtol=1e-5)

    print("KERNEL_OK")
</pallas_src>

<mosaic_0001>
module attributes {stable_mosaic.version = 11 : i64} {
  func.func @_compl_mul_kernel(%arg0: i32, %arg1: memref<1x2x4x8x128xf32, #tpu.memory_space<vmem>>, %arg2: memref<1x2x4x8x128xf32, #tpu.memory_space<vmem>>, %arg3: memref<1x2x8x128xf32, #tpu.memory_space<vmem>>) attributes {dimension_semantics = [#tpu.dimension_semantics<parallel>], iteration_bounds = array<i64: 2>, scalar_prefetch = 0 : i64, scratch_operands = 0 : i64, tpu.core_type = #tpu.core_type<tc>, window_params = [{transform_indices = @transform_0, window_bounds = array<i64: 1, 2, 4, 8, 128>}, {transform_indices = @transform_1, window_bounds = array<i64: 1, 2, 4, 8, 128>}, {transform_indices = @transform_2, window_bounds = array<i64: 1, 2, 8, 128>}]} {
    %c0 = arith.constant 0 : index
    %c0_0 = arith.constant 0 : index
    %c0_1 = arith.constant 0 : index
    %c0_2 = arith.constant 0 : index
    %c0_3 = arith.constant 0 : index
    %0 = vector.load %arg1[%c0, %c0_0, %c0_1, %c0_2, %c0_3] : memref<1x2x4x8x128xf32, #tpu.memory_space<vmem>>, vector<1x1x1x8x128xf32>
    %1 = vector.shape_cast %0 : vector<1x1x1x8x128xf32> to vector<8x128xf32>
    %c0_4 = arith.constant 0 : index
    %c1 = arith.constant 1 : index
    %c0_5 = arith.constant 0 : index
    %c0_6 = arith.constant 0 : index
    %c0_7 = arith.constant 0 : index
    %2 = vector.load %arg1[%c0_4, %c1, %c0_5, %c0_6, %c0_7] : memref<1x2x4x8x128xf32, #tpu.memory_space<vmem>>, vector<1x1x1x8x128xf32>
    %3 = vector.shape_cast %2 : vector<1x1x1x8x128xf32> to vector<8x128xf32>
    %c0_8 = arith.constant 0 : index
    %c0_9 = arith.constant 0 : index
    %c0_10 = arith.constant 0 : index
    %c0_11 = arith.constant 0 : index
    %c0_12 = arith.constant 0 : index
    %4 = vector.load %arg2[%c0_8, %c0_9, %c0_10, %c0_11, %c0_12] : memref<1x2x4x8x128xf32, #tpu.memory_space<vmem>>, vector<1x1x1x8x128xf32>
    %5 = vector.shape_cast %4 : vector<1x1x1x8x128xf32> to vector<8x128xf32>
    %c0_13 = arith.constant 0 : index
    %c1_14 = arith.constant 1 : index
    %c0_15 = arith.constant 0 : index
    %c0_16 = arith.constant 0 : index
    %c0_17 = arith.constant 0 : index
    %6 = vector.load %arg2[%c0_13, %c1_14, %c0_15, %c0_16, %c0_17] : memref<1x2x4x8x128xf32, #tpu.memory_space<vmem>>, vector<1x1x1x8x128xf32>
    %7 = vector.shape_cast %6 : vector<1x1x1x8x128xf32> to vector<8x128xf32>
    %8 = arith.mulf %1, %5 : vector<8x128xf32>
    %9 = arith.mulf %3, %7 : vector<8x128xf32>
    %10 = arith.subf %8, %9 : vector<8x128xf32>
    %11 = arith.mulf %1, %7 : vector<8x128xf32>
    %12 = arith.mulf %3, %5 : vector<8x128xf32>
    %13 = arith.addf %11, %12 : vector<8x128xf32>
    %c0_18 = arith.constant 0 : index
    %c0_19 = arith.constant 0 : index
    %c1_20 = arith.constant 1 : index
    %c0_21 = arith.constant 0 : index
    %c0_22 = arith.constant 0 : index
    %14 = vector.load %arg1[%c0_18, %c0_19, %c1_20, %c0_21, %c0_22] : memref<1x2x4x8x128xf32, #tpu.memory_space<vmem>>, vector<1x1x1x8x128xf32>
    %15 = vector.shape_cast %14 : vector<1x1x1x8x128xf32> to vector<8x128xf32>
    %c0_23 = arith.constant 0 : index
    %c1_24 = arith.constant 1 : index
    %c1_25 = arith.constant 1 : index
    %c0_26 = arith.constant 0 : index
    %c0_27 = arith.constant 0 : index
    %16 = vector.load %arg1[%c0_23, %c1_24, %c1_25, %c0_26, %c0_27] : memref<1x2x4x8x128xf32, #tpu.memory_space<vmem>>, vector<1x1x1x8x128xf32>
    %17 = vector.shape_cast %16 : vector<1x1x1x8x128xf32> to vector<8x128xf32>
    %c0_28 = arith.constant 0 : index
    %c0_29 = arith.constant 0 : index
    %c1_30 = arith.constant 1 : index
    %c0_31 = arith.constant 0 : index
    %c0_32 = arith.constant 0 : index
    %18 = vector.load %arg2[%c0_28, %c0_29, %c1_30, %c0_31, %c0_32] : memref<1x2x4x8x128xf32, #tpu.memory_space<vmem>>, vector<1x1x1x8x128xf32>
    %19 = vector.shape_cast %18 : vector<1x1x1x8x128xf32> to vector<8x128xf32>
    %c0_33 = arith.constant 0 : index
    %c1_34 = arith.constant 1 : index
    %c1_35 = arith.constant 1 : index
    %c0_36 = arith.constant 0 : index
    %c0_37 = arith.constant 0 : index
    %20 = vector.load %arg2[%c0_33, %c1_34, %c1_35, %c0_36, %c0_37] : memref<1x2x4x8x128xf32, #tpu.memory_space<vmem>>, vector<1x1x1x8x128xf32>
    %21 = vector.shape_cast %20 : vector<1x1x1x8x128xf32> to vector<8x128xf32>
    %22 = arith.mulf %15, %19 : vector<8x128xf32>
    %23 = arith.addf %10, %22 : vector<8x128xf32>
    %24 = arith.mulf %17, %21 : vector<8x128xf32>
    %25 = arith.subf %23, %24 : vector<8x128xf32>
    %26 = arith.mulf %15, %21 : vector<8x128xf32>
    %27 = arith.addf %13, %26 : vector<8x128xf32>
    %28 = arith.mulf %17, %19 : vector<8x128xf32>
    %29 = arith.addf %27, %28 : vector<8x128xf32>
    %c0_38 = arith.constant 0 : index
    %c0_39 = arith.constant 0 : index
    %c2 = arith.constant 2 : index
    %c0_40 = arith.constant 0 : index
    %c0_41 = arith.constant 0 : index
    %30 = vector.load %arg1[%c0_38, %c0_39, %c2, %c0_40, %c0_41] : memref<1x2x4x8x128xf32, #tpu.memory_space<vmem>>, vector<1x1x1x8x128xf32>
    %31 = vector.shape_cast %30 : vector<1x1x1x8x128xf32> to vector<8x128xf32>
    %c0_42 = arith.constant 0 : index
    %c1_43 = arith.constant 1 : index
    %c2_44 = arith.constant 2 : index
    %c0_45 = arith.constant 0 : index
    %c0_46 = arith.constant 0 : index
    %32 = vector.load %arg1[%c0_42, %c1_43, %c2_44, %c0_45, %c0_46] : memref<1x2x4x8x128xf32, #tpu.memory_space<vmem>>, vector<1x1x1x8x128xf32>
    %33 = vector.shape_cast %32 : vector<1x1x1x8x128xf32> to vector<8x128xf32>
    %c0_47 = arith.constant 0 : index
    %c0_48 = arith.constant 0 : index
    %c2_49 = arith.constant 2 : index
    %c0_50 = arith.constant 0 : index
    %c0_51 = arith.constant 0 : index
    %34 = vector.load %arg2[%c0_47, %c0_48, %c2_49, %c0_50, %c0_51] : memref<1x2x4x8x128xf32, #tpu.memory_space<vmem>>, vector<1x1x1x8x128xf32>
    %35 = vector.shape_cast %34 : vector<1x1x1x8x128xf32> to vector<8x128xf32>
    %c0_52 = arith.constant 0 : index
    %c1_53 = arith.constant 1 : index
    %c2_54 = arith.constant 2 : index
    %c0_55 = arith.constant 0 : index
    %c0_56 = arith.constant 0 : index
    %36 = vector.load %arg2[%c0_52, %c1_53, %c2_54, %c0_55, %c0_56] : memref<1x2x4x8x128xf32, #tpu.memory_space<vmem>>, vector<1x1x1x8x128xf32>
    %37 = vector.shape_cast %36 : vector<1x1x1x8x128xf32> to vector<8x128xf32>
    %38 = arith.mulf %31, %35 : vector<8x128xf32>
    %39 = arith.addf %25, %38 : vector<8x128xf32>
    %40 = arith.mulf %33, %37 : vector<8x128xf32>
    %41 = arith.subf %39, %40 : vector<8x128xf32>
    %42 = arith.mulf %31, %37 : vector<8x128xf32>
    %43 = arith.addf %29, %42 : vector<8x128xf32>
    %44 = arith.mulf %33, %35 : vector<8x128xf32>
    %45 = arith.addf %43, %44 : vector<8x128xf32>
    %c0_57 = arith.constant 0 : index
    %c0_58 = arith.constant 0 : index
    %c3 = arith.constant 3 : index
    %c0_59 = arith.constant 0 : index
    %c0_60 = arith.constant 0 : index
    %46 = vector.load %arg1[%c0_57, %c0_58, %c3, %c0_59, %c0_60] : memref<1x2x4x8x128xf32, #tpu.memory_space<vmem>>, vector<1x1x1x8x128xf32>
    %47 = vector.shape_cast %46 : vector<1x1x1x8x128xf32> to vector<8x128xf32>
    %c0_61 = arith.constant 0 : index
    %c1_62 = arith.constant 1 : index
    %c3_63 = arith.constant 3 : index
    %c0_64 = arith.constant 0 : index
    %c0_65 = arith.constant 0 : index
    %48 = vector.load %arg1[%c0_61, %c1_62, %c3_63, %c0_64, %c0_65] : memref<1x2x4x8x128xf32, #tpu.memory_space<vmem>>, vector<1x1x1x8x128xf32>
    %49 = vector.shape_cast %48 : vector<1x1x1x8x128xf32> to vector<8x128xf32>
    %c0_66 = arith.constant 0 : index
    %c0_67 = arith.constant 0 : index
    %c3_68 = arith.constant 3 : index
    %c0_69 = arith.constant 0 : index
    %c0_70 = arith.constant 0 : index
    %50 = vector.load %arg2[%c0_66, %c0_67, %c3_68, %c0_69, %c0_70] : memref<1x2x4x8x128xf32, #tpu.memory_space<vmem>>, vector<1x1x1x8x128xf32>
    %51 = vector.shape_cast %50 : vector<1x1x1x8x128xf32> to vector<8x128xf32>
    %c0_71 = arith.constant 0 : index
    %c1_72 = arith.constant 1 : index
    %c3_73 = arith.constant 3 : index
    %c0_74 = arith.constant 0 : index
    %c0_75 = arith.constant 0 : index
    %52 = vector.load %arg2[%c0_71, %c1_72, %c3_73, %c0_74, %c0_75] : memref<1x2x4x8x128xf32, #tpu.memory_space<vmem>>, vector<1x1x1x8x128xf32>
    %53 = vector.shape_cast %52 : vector<1x1x1x8x128xf32> to vector<8x128xf32>
    %54 = arith.mulf %47, %51 : vector<8x128xf32>
    %55 = arith.addf %41, %54 : vector<8x128xf32>
    %56 = arith.mulf %49, %53 : vector<8x128xf32>
    %57 = arith.subf %55, %56 : vector<8x128xf32>
    %58 = arith.mulf %47, %53 : vector<8x128xf32>
    %59 = arith.addf %45, %58 : vector<8x128xf32>
    %60 = arith.mulf %49, %51 : vector<8x128xf32>
    %61 = arith.addf %59, %60 : vector<8x128xf32>
    %c0_76 = arith.constant 0 : index
    %c0_77 = arith.constant 0 : index
    %c0_78 = arith.constant 0 : index
    %c0_79 = arith.constant 0 : index
    %62 = vector.load %arg3[%c0_76, %c0_77, %c0_78, %c0_79] : memref<1x2x8x128xf32, #tpu.memory_space<vmem>>, vector<1x1x8x128xf32>
    %63 = vector.shape_cast %62 : vector<1x1x8x128xf32> to vector<8x128xf32>
    %64 = vector.shape_cast %57 : vector<8x128xf32> to vector<1x1x8x128xf32>
    tpu.vector_store %arg3[%c0_76, %c0_77, %c0_78, %c0_79], %64 {strides = array<i32>} : memref<1x2x8x128xf32, #tpu.memory_space<vmem>>, vector<1x1x8x128xf32>,
    %c0_80 = arith.constant 0 : index
    %c1_81 = arith.constant 1 : index
    %c0_82 = arith.constant 0 : index
    %c0_83 = arith.constant 0 : index
    %65 = vector.load %arg3[%c0_80, %c1_81, %c0_82, %c0_83] : memref<1x2x8x128xf32, #tpu.memory_space<vmem>>, vector<1x1x8x128xf32>
    %66 = vector.shape_cast %65 : vector<1x1x8x128xf32> to vector<8x128xf32>
    %67 = vector.shape_cast %61 : vector<8x128xf32> to vector<1x1x8x128xf32>
    tpu.vector_store %arg3[%c0_80, %c1_81, %c0_82, %c0_83], %67 {strides = array<i32>} : memref<1x2x8x128xf32, #tpu.memory_space<vmem>>, vector<1x1x8x128xf32>,
    return
  }
  func.func @transform_0(%arg0: i32) -> (i32, i32, i32, i32, i32) {
    %c0_i32 = arith.constant 0 : i32
    %c0_i32_0 = arith.constant 0 : i32
    %c0_i32_1 = arith.constant 0 : i32
    %c0_i32_2 = arith.constant 0 : i32
    %c0_i32_3 = arith.constant 0 : i32
    return %arg0, %c0_i32, %c0_i32_0, %c0_i32_1, %c0_i32_2 : i32, i32, i32, i32, i32
  }
  func.func @transform_1(%arg0: i32) -> (i32, i32, i32, i32, i32) {
    %c0_i32 = arith.constant 0 : i32
    %c0_i32_0 = arith.constant 0 : i32
    %c0_i32_1 = arith.constant 0 : i32
    %c0_i32_2 = arith.constant 0 : i32
    %c0_i32_3 = arith.constant 0 : i32
    return %arg0, %c0_i32, %c0_i32_0, %c0_i32_1, %c0_i32_2 : i32, i32, i32, i32, i32
  }
  func.func @transform_2(%arg0: i32) -> (i32, i32, i32, i32) {
    %c0_i32 = arith.constant 0 : i32
    %c0_i32_0 = arith.constant 0 : i32
    %c0_i32_1 = arith.constant 0 : i32
    %c0_i32_2 = arith.constant 0 : i32
    return %arg0, %c0_i32, %c0_i32_0, %c0_i32_1 : i32, i32, i32, i32
  }
}

</mosaic_0001>

<bundles_post_ra>
// kernel: spectral_conv2d_uno_forward.1
= control target key start
LH: loop header
LB: loop body
LE: loop exit
PB: predicated region body
PF: predicated region fallthrough
CT: control target
= control target key end

     0   :  { %s356_s9 = smov 0   ;;  %s390_s0 = inlined_call_operand.vmem [shape: f32[2,2,4,8,128], index: 0, kind: input, shape index: {}]   ;;  %s391_s1 = inlined_call_operand.vmem [shape: f32[2,2,4,8,128], index: 1, kind: input, shape index: {}]   ;;  %s392_s2 = inlined_call_operand.vmem [shape: f32[2,2,8,128], index: 2, kind: output, shape index: {}]  }
   0x1 LB: > { %s294_s10 = sadd.s32 4294967295, %s339_s9   ;;  %p298_p0 = scmp.ge.s32.totalorder %s339_s9, 1  ;;  %s339_s9 = sphi %s356_s9, %s12_s9  }
   0x2   : > { %p122_p1 = scmp.lt.s32.totalorder %s339_s9, 3 }
   0x4   : > { %p123_p2 = pnand %p298_p0, %p122_p1 }
   0x5   : > { %p149_p3 = scmp.lt.s32.totalorder (!%p123_p2), %s294_s10, 1 }
   0x6   : > { %126 = sbr.rel (%p123_p2) target bundleno = 37 (0x25), region = 28 }
   0xd   : > { %s394_s10 = smov (!%p149_p3, %s294_s10), 1 }
   0xe   : > { %s322_s11 = sshll.u32 %s394_s10, 6  ;;  %s324_s18 = sshll.u32 %s394_s10, 4 }
   0xf   : > { %s370_s14 = scalar_lea.vmem %s390_s0, %s322_s11  ;;  %s158_s17 = scalar_lea.vmem %s391_s1, %s322_s11 }
  0x10   : > { %v164_v0 = vld [vmem:[%s370_s14] sm:$0xff]  ;;  %v307_v5 = vld [vmem:[%s370_s14 + $0x8] sm:$0xff]  ;;  %v311_v13 = vld [vmem:[%s370_s14 + $0x10] sm:$0xff]  ;;  %s163_s21 = scalar_lea.vmem %s392_s2, %s324_s18 }
  0x11   : > { %v305_v1 = vld [vmem:[%s370_s14 + $0x20] sm:$0xff]  ;;  %v308_v6 = vld [vmem:[%s370_s14 + $0x28] sm:$0xff]  ;;  %v313_v14 = vld [vmem:[%s158_s17 + $0x10] sm:$0xff] }
  0x12   : > { %v167_v2 = vld [vmem:[%s158_s17] sm:$0xff]  ;;  %v309_v9 = vld [vmem:[%s158_s17 + $0x8] sm:$0xff]  ;;  %v314_v15 = vld [vmem:[%s158_s17 + $0x30] sm:$0xff]  ;;  %v200_v23 = vmul.f32 %v313_v14, %v311_v13 }
  0x13   : > { %v306_v3 = vld [vmem:[%s158_s17 + $0x20] sm:$0xff]  ;;  %v170_v4 = vmul.f32 %v167_v2, %v164_v0  ;;  %v174_v7 = vmul.f32 %v305_v1, %v167_v2  ;;  %v310_v10 = vld [vmem:[%s158_s17 + $0x28] sm:$0xff]  ;;  %v184_v12 = vmul.f32 %v309_v9, %v307_v5  ;;  %v190_v20 = vmul.f32 %v309_v9, %v308_v6  ;;  %v312_v21 = vld [vmem:[%s370_s14 + $0x30] sm:$0xff] }
  0x14   : > { %v171_v8 = vmul.f32 %v306_v3, %v305_v1  ;;  %v173_v11 = vmul.f32 %v306_v3, %v164_v0  ;;  %v188_v16 = vmul.f32 %v310_v10, %v307_v5  ;;  %v186_v18 = vmul.f32 %v310_v10, %v308_v6  ;;  %v315_v26 = vld [vmem:[%s370_s14 + $0x18] sm:$0xff] }
  0x15   : > { %v204_v25 = vmul.f32 %v314_v15, %v311_v13  ;;  %v317_v27 = vld [vmem:[%s158_s17 + $0x18] sm:$0xff]  ;;  %v202_v30 = vmul.f32 %v314_v15, %v312_v21  ;;  %v206_v32 = vmul.f32 %v313_v14, %v312_v21 }
  0x16   : > { %v172_v17 = vsub.f32 %v170_v4, %v171_v8  ;;  %v175_v19 = vadd.f32 %v174_v7, %v173_v11  ;;  %v318_v28 = vld [vmem:[%s158_s17 + $0x38] sm:$0xff]  ;;  %v216_v35 = vmul.f32 %v317_v27, %v315_v26 }
  0x17   : > { %v316_v33 = vld [vmem:[%s370_s14 + $0x38] sm:$0xff]  ;;  %v220_v37 = vmul.f32 %v318_v28, %v315_v26 }
  0x18   : > { %v185_v22 = vadd.f32 %v184_v12, %v172_v17  ;;  %v189_v24 = vadd.f32 %v188_v16, %v175_v19  ;;  %v218_v39 = vmul.f32 %v318_v28, %v316_v33  ;;  %v222_v41 = vmul.f32 %v317_v27, %v316_v33 }
  0x1a   : > { %v187_v29 = vsub.f32 %v185_v22, %v186_v18  ;;  %v191_v31 = vadd.f32 %v190_v20, %v189_v24 }
  0x1c   : > { %v201_v34 = vadd.f32 %v200_v23, %v187_v29  ;;  %v205_v36 = vadd.f32 %v204_v25, %v191_v31 }
  0x1e   : > { %v203_v38 = vsub.f32 %v201_v34, %v202_v30  ;;  %v207_v40 = vadd.f32 %v206_v32, %v205_v36 }
  0x20   : > { %v217_v42 = vadd.f32 %v216_v35, %v203_v38  ;;  %v221_v43 = vadd.f32 %v220_v37, %v207_v40 }
  0x22   : > { %v219_v44 = vsub.f32 %v217_v42, %v218_v39  ;;  %v223_v45 = vadd.f32 %v222_v41, %v221_v43 }
  0x24   : > { %224 = vst [vmem:[%s163_s21] sm:$0xff] %v219_v44  ;;  %319 = vst [vmem:[%s163_s21 + $0x8] sm:$0xff] %v223_v45 }
  0x25 PF: > { %s12_s9 = sadd.s32 1, %s339_s9  }
  0x26   : > { %p9_p4 = scmp.ge.s32.totalorder %s12_s9, 4  }
  0x28   :  { %11 = sbr.rel (!%p9_p4) target bundleno = 1 (0x1), region = 76 }

// kernel: reverse.1
= control target key start
LH: loop header
LB: loop body
LE: loop exit
PB: predicated region body
PF: predicated region fallthrough
CT: control target
= control target key end

     0   :  { %v71_v3 = vlaneseq  ;;  %v64_v9 = vld [vmem:[#allocation0 + $0x7] ss:$-1 sm:$0xff]  ;;  %v78_v12 = vld [vmem:[#allocation0 + $0x17] ss:$-1 sm:$0xff]  ;;  %s329_s0 = inlined_call_operand.vmem [shape: f32[2,4,16,7], index: 0, kind: input, shape index: {}]   ;;  %s330_s1 = inlined_call_operand.vmem [shape: f32[2,4,16,7], index: 1, kind: output, shape index: {}]  }
   0x1   :  { %v44_v0 = vld [vmem:[%s329_s0] sm:$0xff]  ;;  %v46_v1 = vld [vmem:[%s329_s0 + $0x8] sm:$0xff]  ;;  %v48_v2 = vld [vmem:[%s329_s0 + $0x10] sm:$0xff]  ;;  %v65_v10 = vrot.slane %v64_v9, 1  ;;  %v79_v14 = vrot.slane %v78_v12, 1 }
   0x2   :  { %45 = vst [vmem:[#allocation0 + $0x8] sm:$0xff] %v44_v0  ;;  %47 = vst [vmem:[#allocation0 + $0x18] sm:$0xff] %v46_v1  ;;  %v50_v4 = vld [vmem:[%s329_s0 + $0x18] sm:$0xff]  ;;  %v52_v5 = vld [vmem:[%s329_s0 + $0x20] sm:$0xff]  ;;  %v72_v11 = vshrl.u32 %v71_v3, 7 }
   0x3   :  { %49 = vst [vmem:[#allocation0 + $0x28] sm:$0xff] %v48_v2  ;;  %v54_v6 = vld [vmem:[%s329_s0 + $0x28] sm:$0xff]  ;;  %51 = vst [vmem:[#allocation0 + $0x38] sm:$0xff] %v50_v4  ;;  %v56_v7 = vld [vmem:[%s329_s0 + $0x30] sm:$0xff] }
   0x4   :  { %53 = vst [vmem:[#allocation0 + $0x48] sm:$0xff] %v52_v5  ;;  %55 = vst [vmem:[#allocation0 + $0x58] sm:$0xff] %v54_v6  ;;  %v58_v8 = vld [vmem:[%s329_s0 + $0x38] sm:$0xff]  ;;  %v92_v13 = vld [vmem:[#allocation0 + $0x27] ss:$-1 sm:$0xff]  ;;  %vm73_vm0 = vcmp.lt.s32.totalorder %v72_v11, 7 }
   0x5   :  { %57 = vst [vmem:[#allocation0 + $0x68] sm:$0xff] %v56_v7  ;;  %59 = vst [vmem:[#allocation0 + $0x78] sm:$0xff] %v58_v8  ;;  %v93_v15 = vrot.slane %v92_v13, 1  ;;  %v106_v16 = vld [vmem:[#allocation0 + $0x37] ss:$-1 sm:$0xff] }
   0x6   :  { %66 = vst [vmem:[#allocation1] sm:$0xff] %v65_v10  ;;  %v107_v17 = vrot.slane %v106_v16, 1  ;;  %v120_v18 = vld [vmem:[#allocation0 + $0x47] ss:$-1 sm:$0xff]  ;;  %v134_v19 = vld [vmem:[#allocation0 + $0x57] ss:$-1 sm:$0xff] }
   0x7   :  { %80 = vst [vmem:[#allocation1 + $0x8] sm:$0xff] %v79_v14  ;;  %94 = vst [vmem:[#allocation1 + $0x10] sm:$0xff] %v93_v15  ;;  %v121_v20 = vrot.slane %v120_v18, 1  ;;  %v135_v21 = vrot.slane %v134_v19, 1  ;;  %v148_v22 = vld [vmem:[#allocation0 + $0x67] ss:$-1 sm:$0xff] }
   0x8   :  { %v162_v23 = vld [vmem:[#allocation0 + $0x77] ss:$-1 sm:$0xff]  ;;  %108 = vst [vmem:[#allocation1 + $0x18] sm:$0xff] %v107_v17  ;;  %v149_v24 = vrot.slane %v148_v22, 1 }
   0x9   :  { %v163_v25 = vrot.slane %v162_v23, 1  ;;  %v69_v26 = vld [vmem:[#allocation0 + $0xf] ss:$-1 sm:$0xff]  ;;  %v83_v27 = vld [vmem:[#allocation0 + $0x1f] ss:$-1 sm:$0xff]  ;;  %122 = vst [vmem:[#allocation1 + $0x20] sm:$0xff] %v121_v20 }
   0xa   :  { %v97_v28 = vld [vmem:[#allocation0 + $0x2f] ss:$-1 sm:$0xff]  ;;  %136 = vst [vmem:[#allocation1 + $0x28] sm:$0xff] %v135_v21  ;;  %v70_v29 = vrot.slane %v69_v26, 1  ;;  %v84_v30 = vrot.slane %v83_v27, 1  ;;  %150 = vst [vmem:[#allocation1 + $0x30] sm:$0xff] %v149_v24 }
   0xb   :  { %v98_v31 = vrot.slane %v97_v28, 1  ;;  %v111_v32 = vld [vmem:[#allocation0 + $0x3f] ss:$-1 sm:$0xff]  ;;  %164 = vst [vmem:[#allocation1 + $0x38] sm:$0xff] %v163_v25  ;;  %v125_v34 = vld [vmem:[#allocation0 + $0x4f] ss:$-1 sm:$0xff] }
   0xc   :  { %v112_v33 = vrot.slane %v111_v32, 1  ;;  %v139_v35 = vld [vmem:[#allocation0 + $0x5f] ss:$-1 sm:$0xff]  ;;  %74 = vst.msk [vmem:[#allocation1] sm:$0xff] %vm73_vm0, %v70_v29  ;;  %88 = vst.msk [vmem:[#allocation1 + $0x8] sm:$0xff] %vm73_vm0, %v84_v30  ;;  %v126_v36 = vrot.slane %v125_v34, 1 }
   0xd   :  { %102 = vst.msk [vmem:[#allocation1 + $0x10] sm:$0xff] %vm73_vm0, %v98_v31  ;;  %v140_v37 = vrot.slane %v139_v35, 1  ;;  %v153_v38 = vld [vmem:[#allocation0 + $0x6f] ss:$-1 sm:$0xff]  ;;  %v167_v39 = vld [vmem:[#allocation0 + $0x7f] ss:$-1 sm:$0xff] }
   0xe   :  { %116 = vst.msk [vmem:[#allocation1 + $0x18] sm:$0xff] %vm73_vm0, %v112_v33  ;;  %v154_v40 = vrot.slane %v153_v38, 1  ;;  %v168_v41 = vrot.slane %v167_v39, 1  ;;  %130 = vst.msk [vmem:[#allocation1 + $0x20] sm:$0xff] %vm73_vm0, %v126_v36 }
   0xf   :  { %144 = vst.msk [vmem:[#allocation1 + $0x28] sm:$0xff] %vm73_vm0, %v140_v37 }
  0x10   :  { %158 = vst.msk [vmem:[#allocation1 + $0x30] sm:$0xff] %vm73_vm0, %v154_v40  ;;  %172 = vst.msk [vmem:[#allocation1 + $0x38] sm:$0xff] %vm73_vm0, %v168_v41 }
  0x13   :  { %v214_v42 = vld [vmem:[#allocation1] sm:$0xff]  ;;  %v216_v43 = vld [vmem:[#allocation1 + $0x8] sm:$0xff] }
  0x14   :  { %v218_v44 = vld [vmem:[#allocation1 + $0x10] sm:$0xff]  ;;  %215 = vst [vmem:[%s330_s1] sm:$0xff] %v214_v42  ;;  %217 = vst [vmem:[%s330_s1 + $0x8] sm:$0xff] %v216_v43 }
  0x15   :  { %219 = vst [vmem:[%s330_s1 + $0x10] sm:$0xff] %v218_v44  ;;  %v220_v45 = vld [vmem:[#allocation1 + $0x18] sm:$0xff]  ;;  %v222_v46 = vld [vmem:[#allocation1 + $0x20] sm:$0xff] }
  0x16   :  { %221 = vst [vmem:[%s330_s1 + $0x18] sm:$0xff] %v220_v45  ;;  %v224_v47 = vld [vmem:[#allocation1 + $0x28] sm:$0xff]  ;;  %223 = vst [vmem:[%s330_s1 + $0x20] sm:$0xff] %v222_v46 }
  0x17   :  { %225 = vst [vmem:[%s330_s1 + $0x28] sm:$0xff] %v224_v47  ;;  %v226_v48 = vld [vmem:[#allocation1 + $0x30] sm:$0xff]  ;;  %v228_v49 = vld [vmem:[#allocation1 + $0x38] sm:$0xff] }
  0x18   :  { %227 = vst [vmem:[%s330_s1 + $0x30] sm:$0xff] %v226_v48  ;;  %229 = vst [vmem:[%s330_s1 + $0x38] sm:$0xff] %v228_v49 }

</bundles_post_ra>
